<compile_context>
chip_gen: v7x
topology: tpu7x:2x2x1
jax: 0.10.0
libtpu: 0.0.40
codegen_flags: <defaults>
</compile_context>

<pallas_src>
import jax
import jax.numpy as jnp
from jax.experimental import pallas as pl
from jax.experimental.pallas import tpu as pltpu  # noqa: F401  (TPU backend)

# Problem sizes (consistent with the module's forward)
N = 16           # number of nodes
F_IN = 8         # input_size
F_OUT = 32       # output_size
HEADS = 4        # num_heads
NEG_SLOPE = 0.2  # PyG GATConv default leaky_relu negative slope
NEG_INF = -1e30


def gat_kernel(x_ref, adj_ref, wagg_ref, wdst_ref, wsrcT_ref, bias_ref, out_ref):
    # x_ref:     (N, F_IN)        f32 node features
    # adj_ref:   (N, N)           f32 adjacency mask (adj[dst, src], incl. self loops)
    # wagg_ref:  (F_IN, H*F_OUT)  bf16, per-head projection with 1/HEADS folded in
    # wdst_ref:  (F_IN, HEADS)    bf16, att_dst folded into the projection
    # wsrcT_ref: (HEADS, F_IN)    bf16, att_src folded into the projection (transposed)
    # bias_ref:  (1, F_OUT)       f32
    # out_ref:   (N, F_OUT)       f32
    f32 = jnp.float32
    bf16 = jnp.bfloat16

    x_bf = x_ref[...].astype(bf16)                     # one VPU cast, reused 3x
    non_edge = adj_ref[...] <= 0.0                     # (N, N) bool

    # ---- three mutually-independent MXU matmuls (chain depth 1) ----
    # projected features for aggregation; 1/HEADS pre-folded; lane-dense 128 cols
    xp = jnp.dot(x_bf, wagg_ref[...], preferred_element_type=f32)      # (N, H*F_OUT)
    # destination attention scores (att_dst folded into weights at prep time)
    s_dst = jnp.dot(x_bf, wdst_ref[...], preferred_element_type=f32)   # (N, HEADS)
    # source attention scores directly in (HEADS, N) orientation via an
    # NT-style contraction (q @ k^T pattern) -> no in-kernel transpose.
    s_srcT = jax.lax.dot_general(
        wsrcT_ref[...], x_bf,
        dimension_numbers=(((1,), (1,)), ((), ())),
        preferred_element_type=f32)                                    # (HEADS, N)

    xp_bf = xp.astype(bf16)

    acc = jnp.zeros((N, F_OUT), f32)
    for h in range(HEADS):                              # static unroll, HEADS=4
        # logits e[i, j] = s_dst[i, h] + s_src[j, h]   (VPU broadcasts, no MXU)
        e = s_dst[:, h:h + 1] + s_srcT[h:h + 1, :]       # (N, N)
        e = jnp.where(e > 0, e, NEG_SLOPE * e)           # leaky_relu
        e = jnp.where(non_edge, f32(NEG_INF), e)         # mask non-neighbours

        # per-(row, head) numerically-stable softmax over source nodes
        m = jnp.max(e, axis=-1, keepdims=True)           # (N, 1)
        p = jnp.exp(e - m)                               # masked entries -> 0 exactly
        d = jnp.sum(p, axis=-1, keepdims=True)           # (N, 1), always >= 1
        alpha = p * pl.reciprocal(d, approx=True)        # (N, N)

        # attention-weighted aggregation for this head (independent tiny matmul)
        acc = acc + jnp.dot(alpha.astype(bf16),
                            xp_bf[:, h * F_OUT:(h + 1) * F_OUT],
                            preferred_element_type=f32)  # (N, F_OUT)

    out_ref[...] = acc + bias_ref[...]


def prepare_gat_params(w, att_src, att_dst, bias):
    """Parameter-only preprocessing. Call ONCE, outside the per-call hot path."""
    w3 = w.reshape(F_IN, HEADS, F_OUT)
    # fold the attention-score dot products into projection-style weights
    w_dst = jnp.einsum("khc,hc->kh", w3, att_dst)        # (F_IN, HEADS)
    w_srcT = jnp.einsum("khc,hc->hk", w3, att_src)       # (HEADS, F_IN)
    w_agg = w / HEADS                                    # (F_IN, HEADS*F_OUT), head-mean folded
    return (w_agg.astype(jnp.bfloat16),
            w_dst.astype(jnp.bfloat16),
            w_srcT.astype(jnp.bfloat16),
            bias.astype(jnp.float32))


def _full_spec(a):
    return pl.BlockSpec(a.shape, lambda: (0,) * a.ndim)


@jax.jit
def gat_forward(x, edge_index, params):
    """x: (N, F_IN) f32, edge_index: (2, E) int32 (row0=src, row1=dst),
    params: output of prepare_gat_params."""
    w_agg, w_dst, w_srcT, bias = params
    n = x.shape[0]

    # dense adjacency mask adj[dst, src] = 1 (+ self loops); single (N, N) mask
    # shared by all heads (no per-head tiling needed).
    src_idx, dst_idx = edge_index[0], edge_index[1]
    adj = jnp.zeros((n, n), dtype=jnp.float32).at[dst_idx, src_idx].set(1.0)
    adj = jnp.maximum(adj, jnp.eye(n, dtype=jnp.float32))

    operands = (x, adj, w_agg, w_dst, w_srcT, bias)
    return pl.pallas_call(
        gat_kernel,
        out_shape=jax.ShapeDtypeStruct((n, F_OUT), jnp.float32),
        in_specs=[_full_spec(a) for a in operands],
        out_specs=pl.BlockSpec((n, F_OUT), lambda: (0, 0)),
    )(*operands)


def gat_reference(x, edge_index, w, att_src, att_dst, bias):
    """Pure-JAX reference replicating PyG GATConv(heads=H, concat=False)."""
    n = x.shape[0]
    src, dst = edge_index[0], edge_index[1]
    adj = jnp.zeros((n, n), dtype=jnp.float32).at[dst, src].set(1.0)
    adj = jnp.maximum(adj, jnp.eye(n, dtype=jnp.float32))

    xp = (x @ w).reshape(n, HEADS, F_OUT)                     # (N, H, C)
    s_src = jnp.sum(xp * att_src[None], axis=-1)              # (N, H)
    s_dst = jnp.sum(xp * att_dst[None], axis=-1)              # (N, H)
    e = s_dst[:, None, :] + s_src[None, :, :]                 # (N, N, H)
    e = jnp.where(e > 0, e, NEG_SLOPE * e)
    e = jnp.where(adj[:, :, None] > 0, e, NEG_INF)
    e = e - jnp.max(e, axis=1, keepdims=True)
    p = jnp.exp(e) * adj[:, :, None]
    alpha = p / jnp.sum(p, axis=1, keepdims=True)             # (N, N, H)
    out = jnp.einsum("ijh,jhc->ihc", alpha, xp)               # (N, H, C)
    return jnp.mean(out, axis=1) + bias[0]


if __name__ == "__main__":
    key = jax.random.PRNGKey(0)
    k_x, k_e1, k_e2, k_w, k_as, k_ad, k_b = jax.random.split(key, 7)

    # inputs
    x = jax.random.normal(k_x, (N, F_IN), dtype=jnp.float32)
    n_edges = 32
    src = jax.random.randint(k_e1, (n_edges,), 0, N, dtype=jnp.int32)
    dst = jax.random.randint(k_e2, (n_edges,), 0, N, dtype=jnp.int32)
    edge_index = jnp.stack([src, dst], axis=0)  # (2, E)

    # parameters (shapes match GATConv(F_IN, F_OUT, heads=4, concat=False))
    w = 0.1 * jax.random.normal(k_w, (F_IN, HEADS * F_OUT), dtype=jnp.float32)
    att_src = 0.1 * jax.random.normal(k_as, (HEADS, F_OUT), dtype=jnp.float32)
    att_dst = 0.1 * jax.random.normal(k_ad, (HEADS, F_OUT), dtype=jnp.float32)
    bias = 0.1 * jax.random.normal(k_b, (1, F_OUT), dtype=jnp.float32)

    # parameter prep hoisted out of the per-call path (runs once)
    params = prepare_gat_params(w, att_src, att_dst, bias)

    out = gat_forward(x, edge_index, params)
    out = jax.block_until_ready(out)

    ref = gat_reference(x, edge_index, w, att_src, att_dst, bias)
    assert out.shape == (N, F_OUT)
    # 1e-2 tolerance: MXU inputs are bf16 (f32 accumulation) and the softmax
    # denominator uses pl.reciprocal(approx=True); expected error ~1e-3.
    assert jnp.allclose(out, ref, atol=1e-2, rtol=1e-2), "mismatch vs reference"

    print("KERNEL_OK")
</pallas_src>

<mosaic_0001>
module attributes {stable_mosaic.version = 11 : i64} {
  func.func @gat_kernel(%arg0: memref<16x8xf32, #tpu.memory_space<vmem>>, %arg1: memref<16x16xf32, #tpu.memory_space<vmem>>, %arg2: memref<8x128xbf16, #tpu.memory_space<vmem>>, %arg3: memref<8x4xbf16, #tpu.memory_space<vmem>>, %arg4: memref<4x8xbf16, #tpu.memory_space<vmem>>, %arg5: memref<1x32xf32, #tpu.memory_space<vmem>>, %arg6: memref<16x32xf32, #tpu.memory_space<vmem>>) attributes {dimension_semantics = [], scalar_prefetch = 0 : i64, scratch_operands = 0 : i64, tpu.core_type = #tpu.core_type<tc>} {
    %c0 = arith.constant 0 : index
    %c0_0 = arith.constant 0 : index
    %0 = vector.load %arg0[%c0, %c0_0] : memref<16x8xf32, #tpu.memory_space<vmem>>, vector<16x8xf32>
    %1 = arith.truncf %0 : vector<16x8xf32> to vector<16x8xbf16>
    %c0_1 = arith.constant 0 : index
    %c0_2 = arith.constant 0 : index
    %2 = vector.load %arg1[%c0_1, %c0_2] : memref<16x16xf32, #tpu.memory_space<vmem>>, vector<16x16xf32>
    %cst = arith.constant 0.000000e+00 : f32
    %3 = vector.broadcast %cst : f32 to vector<16x16xf32>
    %4 = arith.cmpf ole, %2, %3 : vector<16x16xf32>
    %c0_3 = arith.constant 0 : index
    %c0_4 = arith.constant 0 : index
    %5 = vector.load %arg2[%c0_3, %c0_4] : memref<8x128xbf16, #tpu.memory_space<vmem>>, vector<8x128xbf16>
    %cst_5 = arith.constant dense<0.000000e+00> : vector<16x128xf32>
    %6 = tpu.matmul %1, %5, %cst_5 {dimension_numbers = #tpu.dot_dimension_numbers<[1], [0], [0], [1], [0, 0, 1, 1], [], []>} : vector<16x8xbf16>, vector<8x128xbf16>, vector<16x128xf32> -> vector<16x128xf32>
    %c0_6 = arith.constant 0 : index
    %c0_7 = arith.constant 0 : index
    %7 = vector.load %arg3[%c0_6, %c0_7] : memref<8x4xbf16, #tpu.memory_space<vmem>>, vector<8x4xbf16>
    %cst_8 = arith.constant dense<0.000000e+00> : vector<16x4xf32>
    %8 = tpu.matmul %1, %7, %cst_8 {dimension_numbers = #tpu.dot_dimension_numbers<[1], [0], [0], [1], [0, 0, 1, 1], [], []>} : vector<16x8xbf16>, vector<8x4xbf16>, vector<16x4xf32> -> vector<16x4xf32>
    %c0_9 = arith.constant 0 : index
    %c0_10 = arith.constant 0 : index
    %9 = vector.load %arg4[%c0_9, %c0_10] : memref<4x8xbf16, #tpu.memory_space<vmem>>, vector<4x8xbf16>
    %cst_11 = arith.constant dense<0.000000e+00> : vector<4x16xf32>
    %10 = tpu.matmul %9, %1, %cst_11 {dimension_numbers = #tpu.dot_dimension_numbers<[1], [1], [0], [0], [0, 0, 1, 0], [], []>} : vector<4x8xbf16>, vector<16x8xbf16>, vector<4x16xf32> -> vector<4x16xf32>
    %11 = arith.truncf %6 : vector<16x128xf32> to vector<16x128xbf16>
    %cst_12 = arith.constant 0.000000e+00 : f32
    %12 = vector.broadcast %cst_12 : f32 to vector<16x32xf32>
    %13 = vector.extract_strided_slice %8 {offsets = [0, 0], sizes = [16, 1], strides = [1, 1]} : vector<16x4xf32> to vector<16x1xf32>
    %14 = vector.extract_strided_slice %10 {offsets = [0, 0], sizes = [1, 16], strides = [1, 1]} : vector<4x16xf32> to vector<1x16xf32>
    %15 = vector.broadcast %13 : vector<16x1xf32> to vector<16x16xf32>
    %16 = vector.broadcast %14 : vector<1x16xf32> to vector<16x16xf32>
    %17 = arith.addf %15, %16 : vector<16x16xf32>
    %cst_13 = arith.constant 0.000000e+00 : f32
    %18 = vector.broadcast %cst_13 : f32 to vector<16x16xf32>
    %19 = arith.cmpf ogt, %17, %18 : vector<16x16xf32>
    %cst_14 = arith.constant 2.000000e-01 : f32
    %20 = vector.broadcast %cst_14 : f32 to vector<16x16xf32>
    %21 = arith.mulf %20, %17 : vector<16x16xf32>
    %22 = arith.select %19, %17, %21 : vector<16x16xi1>, vector<16x16xf32>
    %cst_15 = arith.constant -1.000000e+30 : f32
    %23 = vector.broadcast %cst_15 : f32 to vector<16x16xf32>
    %24 = arith.select %4, %23, %22 : vector<16x16xi1>, vector<16x16xf32>
    %cst_16 = arith.constant dense<0xFF800000> : vector<16xf32>
    %25 = vector.multi_reduction <maximumf>, %24, %cst_16 [1] : vector<16x16xf32> to vector<16xf32>
    %26 = vector.shape_cast %25 : vector<16xf32> to vector<16x1xf32>
    %27 = vector.broadcast %26 : vector<16x1xf32> to vector<16x16xf32>
    %28 = arith.subf %24, %27 : vector<16x16xf32>
    %29 = math.exp %28 : vector<16x16xf32>
    %cst_17 = arith.constant dense<0.000000e+00> : vector<16xf32>
    %30 = vector.multi_reduction <add>, %29, %cst_17 [1] : vector<16x16xf32> to vector<16xf32>
    %31 = vector.shape_cast %30 : vector<16xf32> to vector<16x1xf32>
    %32 = tpu.reciprocal %31 {approx = true} : vector<16x1xf32> -> vector<16x1xf32>
    %33 = vector.broadcast %32 : vector<16x1xf32> to vector<16x16xf32>
    %34 = arith.mulf %29, %33 : vector<16x16xf32>
    %35 = arith.truncf %34 : vector<16x16xf32> to vector<16x16xbf16>
    %36 = vector.extract_strided_slice %11 {offsets = [0, 0], sizes = [16, 32], strides = [1, 1]} : vector<16x128xbf16> to vector<16x32xbf16>
    %cst_18 = arith.constant dense<0.000000e+00> : vector<16x32xf32>
    %37 = tpu.matmul %35, %36, %cst_18 {dimension_numbers = #tpu.dot_dimension_numbers<[1], [0], [0], [1], [0, 0, 1, 1], [], []>} : vector<16x16xbf16>, vector<16x32xbf16>, vector<16x32xf32> -> vector<16x32xf32>
    %38 = arith.addf %12, %37 : vector<16x32xf32>
    %39 = vector.extract_strided_slice %8 {offsets = [0, 1], sizes = [16, 1], strides = [1, 1]} : vector<16x4xf32> to vector<16x1xf32>
    %40 = vector.extract_strided_slice %10 {offsets = [1, 0], sizes = [1, 16], strides = [1, 1]} : vector<4x16xf32> to vector<1x16xf32>
    %41 = vector.broadcast %39 : vector<16x1xf32> to vector<16x16xf32>
    %42 = vector.broadcast %40 : vector<1x16xf32> to vector<16x16xf32>
    %43 = arith.addf %41, %42 : vector<16x16xf32>
    %cst_19 = arith.constant 0.000000e+00 : f32
    %44 = vector.broadcast %cst_19 : f32 to vector<16x16xf32>
    %45 = arith.cmpf ogt, %43, %44 : vector<16x16xf32>
    %cst_20 = arith.constant 2.000000e-01 : f32
    %46 = vector.broadcast %cst_20 : f32 to vector<16x16xf32>
    %47 = arith.mulf %46, %43 : vector<16x16xf32>
    %48 = arith.select %45, %43, %47 : vector<16x16xi1>, vector<16x16xf32>
    %cst_21 = arith.constant -1.000000e+30 : f32
    %49 = vector.broadcast %cst_21 : f32 to vector<16x16xf32>
    %50 = arith.select %4, %49, %48 : vector<16x16xi1>, vector<16x16xf32>
    %cst_22 = arith.constant dense<0xFF800000> : vector<16xf32>
    %51 = vector.multi_reduction <maximumf>, %50, %cst_22 [1] : vector<16x16xf32> to vector<16xf32>
    %52 = vector.shape_cast %51 : vector<16xf32> to vector<16x1xf32>
    %53 = vector.broadcast %52 : vector<16x1xf32> to vector<16x16xf32>
    %54 = arith.subf %50, %53 : vector<16x16xf32>
    %55 = math.exp %54 : vector<16x16xf32>
    %cst_23 = arith.constant dense<0.000000e+00> : vector<16xf32>
    %56 = vector.multi_reduction <add>, %55, %cst_23 [1] : vector<16x16xf32> to vector<16xf32>
    %57 = vector.shape_cast %56 : vector<16xf32> to vector<16x1xf32>
    %58 = tpu.reciprocal %57 {approx = true} : vector<16x1xf32> -> vector<16x1xf32>
    %59 = vector.broadcast %58 : vector<16x1xf32> to vector<16x16xf32>
    %60 = arith.mulf %55, %59 : vector<16x16xf32>
    %61 = arith.truncf %60 : vector<16x16xf32> to vector<16x16xbf16>
    %62 = vector.extract_strided_slice %11 {offsets = [0, 32], sizes = [16, 32], strides = [1, 1]} : vector<16x128xbf16> to vector<16x32xbf16>
    %cst_24 = arith.constant dense<0.000000e+00> : vector<16x32xf32>
    %63 = tpu.matmul %61, %62, %cst_24 {dimension_numbers = #tpu.dot_dimension_numbers<[1], [0], [0], [1], [0, 0, 1, 1], [], []>} : vector<16x16xbf16>, vector<16x32xbf16>, vector<16x32xf32> -> vector<16x32xf32>
    %64 = arith.addf %38, %63 : vector<16x32xf32>
    %65 = vector.extract_strided_slice %8 {offsets = [0, 2], sizes = [16, 1], strides = [1, 1]} : vector<16x4xf32> to vector<16x1xf32>
    %66 = vector.extract_strided_slice %10 {offsets = [2, 0], sizes = [1, 16], strides = [1, 1]} : vector<4x16xf32> to vector<1x16xf32>
    %67 = vector.broadcast %65 : vector<16x1xf32> to vector<16x16xf32>
    %68 = vector.broadcast %66 : vector<1x16xf32> to vector<16x16xf32>
    %69 = arith.addf %67, %68 : vector<16x16xf32>
    %cst_25 = arith.constant 0.000000e+00 : f32
    %70 = vector.broadcast %cst_25 : f32 to vector<16x16xf32>
    %71 = arith.cmpf ogt, %69, %70 : vector<16x16xf32>
    %cst_26 = arith.constant 2.000000e-01 : f32
    %72 = vector.broadcast %cst_26 : f32 to vector<16x16xf32>
    %73 = arith.mulf %72, %69 : vector<16x16xf32>
    %74 = arith.select %71, %69, %73 : vector<16x16xi1>, vector<16x16xf32>
    %cst_27 = arith.constant -1.000000e+30 : f32
    %75 = vector.broadcast %cst_27 : f32 to vector<16x16xf32>
    %76 = arith.select %4, %75, %74 : vector<16x16xi1>, vector<16x16xf32>
    %cst_28 = arith.constant dense<0xFF800000> : vector<16xf32>
    %77 = vector.multi_reduction <maximumf>, %76, %cst_28 [1] : vector<16x16xf32> to vector<16xf32>
    %78 = vector.shape_cast %77 : vector<16xf32> to vector<16x1xf32>
    %79 = vector.broadcast %78 : vector<16x1xf32> to vector<16x16xf32>
    %80 = arith.subf %76, %79 : vector<16x16xf32>
    %81 = math.exp %80 : vector<16x16xf32>
    %cst_29 = arith.constant dense<0.000000e+00> : vector<16xf32>
    %82 = vector.multi_reduction <add>, %81, %cst_29 [1] : vector<16x16xf32> to vector<16xf32>
    %83 = vector.shape_cast %82 : vector<16xf32> to vector<16x1xf32>
    %84 = tpu.reciprocal %83 {approx = true} : vector<16x1xf32> -> vector<16x1xf32>
    %85 = vector.broadcast %84 : vector<16x1xf32> to vector<16x16xf32>
    %86 = arith.mulf %81, %85 : vector<16x16xf32>
    %87 = arith.truncf %86 : vector<16x16xf32> to vector<16x16xbf16>
    %88 = vector.extract_strided_slice %11 {offsets = [0, 64], sizes = [16, 32], strides = [1, 1]} : vector<16x128xbf16> to vector<16x32xbf16>
    %cst_30 = arith.constant dense<0.000000e+00> : vector<16x32xf32>
    %89 = tpu.matmul %87, %88, %cst_30 {dimension_numbers = #tpu.dot_dimension_numbers<[1], [0], [0], [1], [0, 0, 1, 1], [], []>} : vector<16x16xbf16>, vector<16x32xbf16>, vector<16x32xf32> -> vector<16x32xf32>
    %90 = arith.addf %64, %89 : vector<16x32xf32>
    %91 = vector.extract_strided_slice %8 {offsets = [0, 3], sizes = [16, 1], strides = [1, 1]} : vector<16x4xf32> to vector<16x1xf32>
    %92 = vector.extract_strided_slice %10 {offsets = [3, 0], sizes = [1, 16], strides = [1, 1]} : vector<4x16xf32> to vector<1x16xf32>
    %93 = vector.broadcast %91 : vector<16x1xf32> to vector<16x16xf32>
    %94 = vector.broadcast %92 : vector<1x16xf32> to vector<16x16xf32>
    %95 = arith.addf %93, %94 : vector<16x16xf32>
    %cst_31 = arith.constant 0.000000e+00 : f32
    %96 = vector.broadcast %cst_31 : f32 to vector<16x16xf32>
    %97 = arith.cmpf ogt, %95, %96 : vector<16x16xf32>
    %cst_32 = arith.constant 2.000000e-01 : f32
    %98 = vector.broadcast %cst_32 : f32 to vector<16x16xf32>
    %99 = arith.mulf %98, %95 : vector<16x16xf32>
    %100 = arith.select %97, %95, %99 : vector<16x16xi1>, vector<16x16xf32>
    %cst_33 = arith.constant -1.000000e+30 : f32
    %101 = vector.broadcast %cst_33 : f32 to vector<16x16xf32>
    %102 = arith.select %4, %101, %100 : vector<16x16xi1>, vector<16x16xf32>
    %cst_34 = arith.constant dense<0xFF800000> : vector<16xf32>
    %103 = vector.multi_reduction <maximumf>, %102, %cst_34 [1] : vector<16x16xf32> to vector<16xf32>
    %104 = vector.shape_cast %103 : vector<16xf32> to vector<16x1xf32>
    %105 = vector.broadcast %104 : vector<16x1xf32> to vector<16x16xf32>
    %106 = arith.subf %102, %105 : vector<16x16xf32>
    %107 = math.exp %106 : vector<16x16xf32>
    %cst_35 = arith.constant dense<0.000000e+00> : vector<16xf32>
    %108 = vector.multi_reduction <add>, %107, %cst_35 [1] : vector<16x16xf32> to vector<16xf32>
    %109 = vector.shape_cast %108 : vector<16xf32> to vector<16x1xf32>
    %110 = tpu.reciprocal %109 {approx = true} : vector<16x1xf32> -> vector<16x1xf32>
    %111 = vector.broadcast %110 : vector<16x1xf32> to vector<16x16xf32>
    %112 = arith.mulf %107, %111 : vector<16x16xf32>
    %113 = arith.truncf %112 : vector<16x16xf32> to vector<16x16xbf16>
    %114 = vector.extract_strided_slice %11 {offsets = [0, 96], sizes = [16, 32], strides = [1, 1]} : vector<16x128xbf16> to vector<16x32xbf16>
    %cst_36 = arith.constant dense<0.000000e+00> : vector<16x32xf32>
    %115 = tpu.matmul %113, %114, %cst_36 {dimension_numbers = #tpu.dot_dimension_numbers<[1], [0], [0], [1], [0, 0, 1, 1], [], []>} : vector<16x16xbf16>, vector<16x32xbf16>, vector<16x32xf32> -> vector<16x32xf32>
    %116 = arith.addf %90, %115 : vector<16x32xf32>
    %c0_37 = arith.constant 0 : index
    %c0_38 = arith.constant 0 : index
    %117 = vector.load %arg5[%c0_37, %c0_38] : memref<1x32xf32, #tpu.memory_space<vmem>>, vector<1x32xf32>
    %118 = vector.broadcast %117 : vector<1x32xf32> to vector<16x32xf32>
    %119 = arith.addf %116, %118 : vector<16x32xf32>
    %c0_39 = arith.constant 0 : index
    %c0_40 = arith.constant 0 : index
    %120 = vector.load %arg6[%c0_39, %c0_40] : memref<16x32xf32, #tpu.memory_space<vmem>>, vector<16x32xf32>
    tpu.vector_store %arg6[%c0_39, %c0_40], %119 {strides = array<i32>} : memref<16x32xf32, #tpu.memory_space<vmem>>, vector<16x32xf32>,
    return
  }
}

</mosaic_0001>

<bundles_post_ra>
// kernel: gat_forward.1
= control target key start
LH: loop header
LB: loop body
LE: loop exit
PB: predicated region body
PF: predicated region fallthrough
CT: control target
= control target key end

     0   :  { %vm37_vm0 = vcmask 1043456   ;;  %v711_v2 = vmov 0.0   ;;  %vm712_vm1 = vmmov 0   ;;  %vm33_vm2 = vcmask 64512   ;;  %s867_s0 = inlined_call_operand.vmem [shape: f32[16,8], index: 0, kind: input, shape index: {}]   ;;  %s868_s1 = inlined_call_operand.vmem [shape: f32[16,16], index: 1, kind: input, shape index: {}]   ;;  %s869_s2 = inlined_call_operand.vmem [shape: bf16[8,128], index: 2, kind: input, shape index: {}]   ;;  %s870_s3 = inlined_call_operand.vmem [shape: bf16[8,4], index: 3, kind: input, shape index: {}]   ;;  %s871_s4 = inlined_call_operand.vmem [shape: bf16[4,8], index: 4, kind: input, shape index: {}]   ;;  %s872_s5 = inlined_call_operand.vmem [shape: f32[1,32], index: 5, kind: input, shape index: {}]   ;;  %s873_s6 = inlined_call_operand.hbm [shape: f32[16,32], index: 6, kind: output, shape index: {}]  }
   0x1   :  { %v82_v0 = vld [vmem:[%s870_s3] sm:$0xf]  ;;  %601 = vmatprep.subr.bf16.mxu1 %v711_v2  ;;  %603 = vmatprep.mubr.msk.bf16.mxu1 %vm712_vm1, %v711_v2  ;;  %v26_v4 = vld [vmem:[%s867_s0 + $0x8] sm:$0xff] }
   0x2   :  { %v25_v1 = vld [vmem:[%s867_s0] sm:$0xff]  ;;  %v84_v3 = vsel %vm37_vm0, %v82_v0, 0  ;;  %595 = vmatprep.subr.bf16.mxu0 %v711_v2 }
   0x3   :  { %v32_v5 = vld [vmem:[%s869_s2] sm:$0xf]  ;;  %602 = vmatpush3.bf16.msra.mxu1 %v84_v3  ;;  %v27_v6 = vpack.c.bf16 %v26_v4, %v25_v1 }
   0x4   :  { %v39_v7 = vsel %vm37_vm0, %v32_v5, 0 }
   0x5   :  { %11 = vsyncpa [#allocation3], 0  ;;  %596 = vmatpush3.bf16.msra.mxu0 %v39_v7  ;;  %597 = vmatprep.mubr.msk.bf16.mxu0 %vm712_vm1, %v711_v2  ;;  %v713_v8 = vmov 1   ;;  %v714_v9 = vmov 0   ;;  %v35_v10 = vsel %vm33_vm2, %v27_v6, 0  ;;  %v715_v21 = vmov 2  }
   0x6   :  { %607 = vmatprep.subr.bf16.mxu0 %v711_v2  ;;  %649 = vset.pattern.permute.xlu0 %v713_v8  ;;  %v127_v11 = vld [vmem:[%s871_s4] sm:$0x3]  ;;  %v716_v22 = vmov 3   ;;  %v182_v27 = vlaneseq  ;;  %v805_v38 = vld [vmem:[%s868_s1 + $0x8] sm:$0xff]  ;;  %vm196_vm6 = vcmask 130048   ;;  %s718_s7 = smov 32  }
   0x7   :  { %604 = vmatmul.mubr.msk.bf16.vlgmr.msra.gmra.mrb[0].mxu1 %vm33_vm2, %v27_v6  ;;  %650 = vset.pattern.permute.xlu1 %v714_v9  ;;  %v799_v33 = vld [vmem:[%s868_s1] sm:$0xff]  ;;  %vm31_vm7 = vcmp.le.f32.partialorder %v805_v38, 0.0  ;;  %s717_s1 = smov 96   ;;  %s719_s8 = smov 64   ;;  %vm554_vm14 = vcmask 261120  }
   0x8   :  { %598 = vmatmul.mubr.msk.bf16.vlgmr.msra.gmra.mrb[0].mxu0 %vm33_vm2, %v27_v6  ;;  %613 = vmatprep.subr.bf16.mxu1 %v711_v2  ;;  %v183_v28 = vshrl.u32 %v182_v27, 7  ;;  %vm30_vm3 = vcmp.le.f32.partialorder %v799_v33, 0.0  ;;  %s720_s11 = smov [#allocation2]  }
   0x9   :  { %609 = vmatprep.mubr.msk.bf16.mxu0 %vm712_vm1, %v711_v2  ;;  %615 = vmatprep.mubr.msk.bf16.mxu1 %vm712_vm1, %v711_v2  ;;  %s562_s12 = sshll.u32 %s720_s11, 4  ;;  %s563_s12 = int_to_ptr.vmem [resolvable:$true] %s562_s12 }
   0xa   :  { %v184_v29 = vsub.s32 0, %v183_v28  ;;  %v230_v30 = vsub.s32 1, %v183_v28  ;;  %v367_v43 = vsub.s32 2, %v183_v28  ;;  %v461_v57 = vsub.s32 3, %v183_v28  ;;  %s687_s13 = scalar_lea.vmem %s563_s12, 256  ;;  %p692_p1 = scmp.lt.s32.totalorder %s563_s12, %s563_s12 }
   0xb   :  { %p688_p0 = scmp.ne.s32.totalorder %s563_s12, %s687_s13  ;;  %p693_p2 = scmp.lt.s32.totalorder %s687_s13, %s687_s13 }
   0xd   :  { %p694_p3 = por %p693_p2, %p692_p1 }
   0xe   :  { %608 = vmatpush3.bf16.xpose.msra.mxu0 %v35_v10 }
   0xf   :  { %619 = vmatprep.subr.bf16.mxu0 %v711_v2  ;;  %p695_p4 = pnand %p694_p3, %p688_p0 }
  0x15   :  { %610 = vmatmul.mubr.msk.bf16.vlgmr.msra.gmra.mrb[4].mxu0 %vm33_vm2, %v127_v11 }
  0x16   :  { %621 = vmatprep.mubr.msk.bf16.mxu0 %vm712_vm1, %v711_v2 }
  0xda   :  { %v120_v12 = vpop.f32.mrb[0].mxu1 }
  0xdb   :  { %174 = vperm.xlu1 %650, %v120_v12   ;;  %221 = vperm.xlu0 %649, %v120_v12   ;;  %v605_v13 = vpop.f32.mrb[1].mxu1  ;;  %v75_v14 = vpop.f32.mrb[0].mxu0 }
  0xdc   :  { %v123_v15 = vpop.f32.mrb[2].mxu1  ;;  %v599_v16 = vpop.f32.mrb[1].mxu0 }
  0xdd   :  { %v606_v17 = vpop.f32.mrb[3].mxu1  ;;  %v78_v18 = vpop.f32.mrb[2].mxu0 }
  0xde   :  { %v792_v19 = vpack.c.bf16 %v78_v18, %v75_v14  ;;  %v600_v20 = vpop.f32.mrb[3].mxu0 }
  0xdf   :  { %179 = vperm.xlu1 %650, %v123_v15   ;;  %225 = vperm.xlu0 %649, %v123_v15  }
  0xe0   :  { %620 = vmatpush3.bf16.msra.mxu0 %v792_v19 }
  0xe1   :  { %631 = vmatprep.subr.bf16.mxu0 %v711_v2 }
  0xe3   :  { %652 = vset.pattern.permute.xlu1 %v715_v21  ;;  %651 = vset.pattern.permute.xlu0 %v715_v21 }
  0xe4   :  { %362 = vperm.xlu1 %652, %v123_v15   ;;  %358 = vperm.xlu0 %651, %v120_v12  }
  0xe8   :  { %653 = vset.pattern.permute.xlu1 %v716_v22  ;;  %654 = vset.pattern.permute.xlu0 %v716_v22  ;;  %v165_v23 = vpop.f32.mrb[4].mxu0 }
  0xe9   :  { %452 = vperm.xlu1 %653, %v120_v12   ;;  %456 = vperm.xlu0 %654, %v123_v15   ;;  %v611_v24 = vpop.f32.mrb[5].mxu0  ;;  %v185_v31 = vrot.slane %v165_v23, %v184_v29  ;;  %v231_v32 = vrot.slane %v165_v23, %v230_v30  ;;  %v368_v52 = vrot.slane %v165_v23, %v367_v43 }
  0xea   :  { %v168_v25 = vpop.f32.mrb[6].mxu0  ;;  %v462_v4 = vrot.slane %v165_v23, %v461_v57 }
  0xeb   :  { %v612_v26 = vpop.f32.mrb[7].mxu0 }
 0x15a   :  { %v175_v34 = vpop.permute.xlu1 %174  ;;  %v222_v35 = vpop.permute.xlu0 %221 }
 0x15b   :  { %v186_v36 = vadd.f32 %v185_v31, %v175_v34  ;;  %v232_v37 = vadd.f32 %v231_v32, %v222_v35 }
 0x15d   :  { %v190_v39 = vmul.f32 0.2, %v186_v36  ;;  %v236_v40 = vmul.f32 0.2, %v232_v37  ;;  %vm234_vm4 = vcmp.gt.f32.partialorder %v232_v37, 0.0  ;;  %vm188_vm5 = vcmp.gt.f32.partialorder %v186_v36, 0.0 }
 0x15e   :  { %v180_v41 = vpop.permute.xlu1 %179  ;;  %v226_v42 = vpop.permute.xlu0 %225 }
 0x15f   :  { %v187_v44 = vadd.f32 %v185_v31, %v180_v41  ;;  %v233_v45 = vadd.f32 %v231_v32, %v226_v42  ;;  %v238_v46 = vsel %vm234_vm4, %v232_v37, %v236_v40  ;;  %v192_v47 = vsel %vm188_vm5, %v186_v36, %v190_v39 }
 0x160   :  { %v240_v48 = vsel %vm30_vm3, -1e+30, %v238_v46  ;;  %v194_v53 = vsel %vm30_vm3, -1e+30, %v192_v47 }
 0x161   :  { %v191_v49 = vmul.f32 0.2, %v187_v44  ;;  %v237_v50 = vmul.f32 0.2, %v233_v45  ;;  %v242_v51 = vsel %vm196_vm6, %v240_v48, -inf  ;;  %vm235_vm8 = vcmp.gt.f32.partialorder %v233_v45, 0.0 }
 0x162   :  { %243 = vmax.xlane.f32.xlu1 %v242_v51  ;;  %vm189_vm9 = vcmp.gt.f32.partialorder %v187_v44, 0.0  ;;  %v197_v63 = vsel %vm196_vm6, %v194_v53, -inf }
 0x163   :  { %v363_v54 = vpop.permute.xlu1 %362  ;;  %v359_v55 = vpop.permute.xlu0 %358  ;;  %v239_v56 = vsel %vm235_vm8, %v233_v45, %v237_v50  ;;  %v193_v58 = vsel %vm189_vm9, %v187_v44, %v191_v49 }
 0x164   :  { %v370_v59 = vadd.f32 %v368_v52, %v363_v54  ;;  %v369_v60 = vadd.f32 %v368_v52, %v359_v55  ;;  %v241_v61 = vsel %vm31_vm7, -1e+30, %v239_v56  ;;  %v195_v0 = vsel %vm31_vm7, -1e+30, %v193_v58 }
 0x165   :  { %v245_v62 = vsel %vm196_vm6, %v241_v61, -inf  ;;  %v200_v11 = vsel %vm196_vm6, %v195_v0, -inf }
 0x166   :  { %v374_v1 = vmul.f32 0.2, %v370_v59  ;;  %v373_v3 = vmul.f32 0.2, %v369_v60  ;;  %246 = vmax.xlane.f32.xlu0 %v245_v62  ;;  %198 = vmax.xlane.f32.xlu1 %v197_v63  ;;  %vm371_vm10 = vcmp.gt.f32.partialorder %v369_v60, 0.0  ;;  %vm372_vm11 = vcmp.gt.f32.partialorder %v370_v59, 0.0 }
 0x168   :  { %v453_v5 = vpop.permute.xlu1 %452  ;;  %v457_v6 = vpop.permute.xlu0 %456  ;;  %v375_v7 = vsel %vm371_vm10, %v369_v60, %v373_v3  ;;  %v376_v8 = vsel %vm372_vm11, %v370_v59, %v374_v1 }
 0x169   :  { %v463_v9 = vadd.f32 %v462_v4, %v453_v5  ;;  %v464_v10 = vadd.f32 %v462_v4, %v457_v6  ;;  %v377_v12 = vsel %vm30_vm3, -1e+30, %v375_v7  ;;  %v378_v14 = vsel %vm31_vm7, -1e+30, %v376_v8 }
 0x16a   :  { %201 = vmax.xlane.f32.xlu0 %v200_v11  ;;  %v379_v13 = vsel %vm196_vm6, %v377_v12, -inf  ;;  %v382_v17 = vsel %vm196_vm6, %v378_v14, -inf }
 0x16b   :  { %v467_v15 = vmul.f32 0.2, %v463_v9  ;;  %v468_v16 = vmul.f32 0.2, %v464_v10  ;;  %380 = vmax.xlane.f32.xlu1 %v379_v13  ;;  %vm465_vm12 = vcmp.gt.f32.partialorder %v463_v9, 0.0  ;;  %vm466_vm13 = vcmp.gt.f32.partialorder %v464_v10, 0.0 }
 0x16d   :  { %v469_v18 = vsel %vm465_vm12, %v463_v9, %v467_v15  ;;  %v470_v20 = vsel %vm466_vm13, %v464_v10, %v468_v16 }
 0x16e   :  { %383 = vmax.xlane.f32.xlu0 %v382_v17  ;;  %v471_v21 = vsel %vm30_vm3, -1e+30, %v469_v18  ;;  %v472_v22 = vsel %vm31_vm7, -1e+30, %v470_v20 }
 0x16f   :  { %v473_v23 = vsel %vm196_vm6, %v471_v21, -inf  ;;  %v476_v24 = vsel %vm196_vm6, %v472_v22, -inf }
 0x170   :  { %474 = vmax.xlane.f32.xlu1 %v473_v23 }
 0x172   :  { %477 = vmax.xlane.f32.xlu0 %v476_v24 }
 0x181   :  { %266 = vrot.lane.b32.xlu1 %v792_v19, %s717_s1 }
 0x1ef   :  { %v244_v25 = vpop.xlane.xlu1 %243 }
 0x1f0   :  { %v248_v26 = vsub.f32 %v240_v48, %v244_v25 }
 0x1f2   :  { %v250_v27 = vmul.f32 1.442695, %v248_v26 }
 0x1f3   :  { %v247_v28 = vpop.xlane.xlu0 %246  ;;  %v199_v29 = vpop.xlane.xlu1 %198 }
 0x1f4   :  { %655 = vpow2.f32 %v250_v27  ;;  %v249_v30 = vsub.f32 %v241_v61, %v247_v28  ;;  %v203_v31 = vsub.f32 %v194_v53, %v199_v29 }
 0x1f6   :  { %v252_v32 = vmul.f32 1.442695, %v249_v30  ;;  %v205_v33 = vmul.f32 1.442695, %v203_v31 }
 0x1f7   :  { %v202_v34 = vpop.xlane.xlu0 %201 }
 0x1f8   :  { %657 = vpow2.f32 %v252_v32  ;;  %v204_v35 = vsub.f32 %v195_v0, %v202_v34  ;;  %v381_v36 = vpop.xlane.xlu1 %380 }
 0x1f9   :  { %659 = vpow2.f32 %v205_v33  ;;  %v385_v37 = vsub.f32 %v377_v12, %v381_v36 }
 0x1fa   :  { %v207_v38 = vmul.f32 1.442695, %v204_v35 }
 0x1fb   :  { %v387_v39 = vmul.f32 1.442695, %v385_v37  ;;  %v384_v40 = vpop.xlane.xlu0 %383 }
 0x1fc   :  { %661 = vpow2.f32 %v207_v38  ;;  %v386_v41 = vsub.f32 %v378_v14, %v384_v40 }
 0x1fd   :  { %663 = vpow2.f32 %v387_v39  ;;  %v475_v42 = vpop.xlane.xlu1 %474 }
 0x1fe   :  { %v656_v43 = vpop.eup %655  ;;  %v389_v44 = vmul.f32 1.442695, %v386_v41  ;;  %v479_v45 = vsub.f32 %v471_v21, %v475_v42 }
 0x1ff   :  { %v478_v46 = vpop.xlane.xlu0 %477  ;;  %v254_v47 = vsel %vm196_vm6, %v656_v43, 0.0 }
 0x200   :  { %665 = vpow2.f32 %v389_v44  ;;  %v481_v48 = vmul.f32 1.442695, %v479_v45  ;;  %v480_v49 = vsub.f32 %v472_v22, %v478_v46  ;;  %255 = vadd.xlane.f32.xlu1 %v254_v47 }
 0x201   :  { %v267_v50 = vpop.permute.xlu1 %266 }
 0x202   :  { %v658_v51 = vpop.eup %657  ;;  %667 = vpow2.f32 %v481_v48  ;;  %v483_v52 = vmul.f32 1.442695, %v480_v49  ;;  %614 = vmatpush3.bf16.msra.mxu1 %v267_v50  ;;  %v580_v49 = vld [vmem:[%s872_s5] ss:$0 sm:$0xff] }
 0x203   :  { %v660_v53 = vpop.eup %659  ;;  %v257_v54 = vsel %vm196_vm6, %v658_v51, 0.0  ;;  %625 = vmatprep.subr.bf16.mxu1 %v711_v2 }
 0x204   :  { %669 = vpow2.f32 %v483_v52  ;;  %258 = vadd.xlane.f32.xlu0 %v257_v54  ;;  %v209_v55 = vsel %vm196_vm6, %v660_v53, 0.0 }
 0x205   :  { %210 = vadd.xlane.f32.xlu1 %v209_v55 }
 0x206   :  { %v662_v56 = vpop.eup %661 }
 0x207   :  { %v664_v57 = vpop.eup %663  ;;  %v212_v58 = vsel %vm196_vm6, %v662_v56, 0.0 }
 0x208   :  { %213 = vadd.xlane.f32.xlu0 %v212_v58  ;;  %v391_v59 = vsel %vm196_vm6, %v664_v57, 0.0 }
 0x209   :  { %392 = vadd.xlane.f32.xlu1 %v391_v59 }
 0x20a   :  { %v666_v60 = vpop.eup %665 }
 0x20b   :  { %v394_v61 = vsel %vm196_vm6, %v666_v60, 0.0 }
 0x20c   :  { %v668_v62 = vpop.eup %667  ;;  %395 = vadd.xlane.f32.xlu0 %v394_v61 }
 0x20d   :  { %v485_v63 = vsel %vm196_vm6, %v668_v62, 0.0 }
 0x20e   :  { %v670_v0 = vpop.eup %669  ;;  %486 = vadd.xlane.f32.xlu1 %v485_v63 }
 0x20f   :  { %v488_v1 = vsel %vm196_vm6, %v670_v0, 0.0 }
 0x210   :  { %489 = vadd.xlane.f32.xlu0 %v488_v1 }
 0x21f   :  { %496 = vrot.lane.b32.xlu1 %v792_v19, %s718_s7 }
 0x226   :  { %402 = vrot.lane.b32.xlu0 %v792_v19, %s719_s8 }
 0x28d   :  { %v256_v3 = vpop.xlane.xlu1 %255 }
 0x28e   :  { %671 = vrcp.f32 %v256_v3 }
 0x291   :  { %v259_v4 = vpop.xlane.xlu0 %258 }
 0x292   :  { %673 = vrcp.f32 %v259_v4  ;;  %v211_v5 = vpop.xlane.xlu1 %210 }
 0x293   :  { %675 = vrcp.f32 %v211_v5 }
 0x295   :  { %v214_v6 = vpop.xlane.xlu0 %213 }
 0x296   :  { %677 = vrcp.f32 %v214_v6  ;;  %v393_v7 = vpop.xlane.xlu1 %392 }
 0x297   :  { %679 = vrcp.f32 %v393_v7 }
 0x298   :  { %v672_v9 = vpop.eup %671 }
 0x299   :  { %v396_v8 = vpop.xlane.xlu0 %395  ;;  %v262_v12 = vmul.f32 %v672_v9, %v656_v43 }
 0x29a   :  { %681 = vrcp.f32 %v396_v8 }
 0x29b   :  { %v487_v10 = vpop.xlane.xlu1 %486 }
 0x29c   :  { %v674_v11 = vpop.eup %673  ;;  %683 = vrcp.f32 %v487_v10 }
 0x29d   :  { %v263_v13 = vmul.f32 %v674_v11, %v658_v51  ;;  %v490_v14 = vpop.xlane.xlu0 %489  ;;  %v676_v19 = vpop.eup %675 }
 0x29e   :  { %685 = vrcp.f32 %v490_v14  ;;  %v217_v17 = vmul.f32 %v676_v19, %v660_v53 }
 0x29f   :  { %v264_v15 = vpack.c.bf16 %v263_v13, %v262_v12  ;;  %v497_v26 = vpop.permute.xlu1 %496 }
 0x2a0   :  { %v678_v16 = vpop.eup %677 }
 0x2a1   :  { %v218_v18 = vmul.f32 %v678_v16, %v662_v56  ;;  %v403_v20 = vpop.permute.xlu0 %402  ;;  %616 = vmatmul.mubr.msk.bf16.vlgmr.msra.gmra.mrb[4].mxu1 %vm196_vm6, %v264_v15  ;;  %v680_v21 = vpop.eup %679 }
 0x2a2   :  { %626 = vmatpush3.bf16.msra.mxu1 %v403_v20  ;;  %627 = vmatprep.mubr.msk.bf16.mxu1 %vm712_vm1, %v711_v2  ;;  %v399_v24 = vmul.f32 %v680_v21, %v664_v57 }
 0x2a3   :  { %v219_v22 = vpack.c.bf16 %v218_v18, %v217_v17 }
 0x2a4   :  { %v682_v23 = vpop.eup %681 }
 0x2a5   :  { %v400_v25 = vmul.f32 %v682_v23, %v666_v60  ;;  %622 = vmatmul.mubr.msk.bf16.vlgmr.msra.gmra.mrb[8].mxu0 %vm196_vm6, %v219_v22 }
 0x2a6   :  { %v684_v27 = vpop.eup %683  ;;  %632 = vmatpush3.bf16.msra.mxu0 %v497_v26  ;;  %633 = vmatprep.mubr.msk.bf16.mxu0 %vm712_vm1, %v711_v2 }
 0x2a7   :  { %v401_v28 = vpack.c.bf16 %v400_v25, %v399_v24  ;;  %v493_v30 = vmul.f32 %v684_v27, %v668_v62 }
 0x2a8   :  { %v686_v29 = vpop.eup %685 }
 0x2a9   :  { %v494_v31 = vmul.f32 %v686_v29, %v670_v0  ;;  %628 = vmatmul.mubr.msk.bf16.vlgmr.msra.gmra.mrb[8].mxu1 %vm196_vm6, %v401_v28 }
 0x2ab   :  { %v495_v32 = vpack.c.bf16 %v494_v31, %v493_v30 }
 0x2ad   :  { %634 = vmatmul.mubr.msk.bf16.vlgmr.msra.gmra.mrb[12].mxu0 %vm196_vm6, %v495_v32 }
 0x374   :  { %v306_v33 = vpop.f32.mrb[4].mxu1 }
 0x375   :  { %v617_v34 = vpop.f32.mrb[5].mxu1 }
 0x376   :  { %v309_v35 = vpop.f32.mrb[6].mxu1 }
 0x377   :  { %v618_v36 = vpop.f32.mrb[7].mxu1 }
 0x378   :  { %v350_v37 = vpop.f32.mrb[8].mxu0 }
 0x379   :  { %v351_v38 = vadd.f32 %v350_v37, %v306_v33  ;;  %v623_v39 = vpop.f32.mrb[9].mxu0 }
 0x37a   :  { %v353_v40 = vpop.f32.mrb[10].mxu0 }
 0x37b   :  { %v354_v41 = vadd.f32 %v353_v40, %v309_v35  ;;  %v624_v42 = vpop.f32.mrb[11].mxu0 }
 0x37c   :  { %v442_v2 = vpop.f32.mrb[8].mxu1 }
 0x37d   :  { %v449_v43 = vadd.f32 %v442_v2, %v351_v38  ;;  %v629_v44 = vpop.f32.mrb[9].mxu1 }
 0x37e   :  { %v445_v45 = vpop.f32.mrb[10].mxu1 }
 0x37f   :  { %v450_v46 = vadd.f32 %v445_v45, %v354_v41  ;;  %v630_v47 = vpop.f32.mrb[11].mxu1 }
 0x380   :  { %v536_v48 = vpop.f32.mrb[12].mxu0 }
 0x381   :  { %v543_v50 = vadd.f32 %v536_v48, %v449_v43  ;;  %v635_v51 = vpop.f32.mrb[13].mxu0 }
 0x382   :  { %v539_v52 = vpop.f32.mrb[14].mxu0 }
 0x383   :  { %v552_v53 = vadd.f32 %v580_v49, %v543_v50  ;;  %v544_v54 = vadd.f32 %v539_v52, %v450_v46  ;;  %v636_v55 = vpop.f32.mrb[15].mxu0 }
 0x385   :  { %555 = vst.msk [vmem:[#allocation2] sm:$0xff] %vm554_vm14, %v552_v53  ;;  %v553_v56 = vadd.f32 %v580_v49, %v544_v54 }
 0x387   :  { %556 = vst.msk [vmem:[#allocation2 + $0x8] sm:$0xff] %vm554_vm14, %v553_v56 }
 0x388   :  { %698 = shalt.err (!%p695_p4)
}
 0x389   :  { %s699_s15 = scalar_lea.hbm %s873_s6, 256 }
 0x38a   :  { %p700_p5 = scmp.ne.s32.totalorder %s873_s6, %s699_s15  ;;  %p703_p6 = scmp.lt.u32.totalorder %s699_s15, %s873_s6 }
 0x38c   :  { %p705_p7 = pnand %p703_p6, %p700_p5 }
 0x38e   :  { %708 = shalt.err (!%p705_p7)
}
 0x38f   :  { %s721_s20 = smov 128   ;;  %s722_s21 = smov 8  }
 0x390   :  { %568 = dma.vmem_to_hbm [thread:$0]  %s563_s12, 256, %s873_s6, [#allocation3], %s721_s20, %s721_s20, %s722_s21  }
 0x391   :  { %709 = dma.done.wait [#allocation3], 256  }
 0x392   :  { %710 = vsyncadd [#allocation3], 4294967040 }
 0x393   :  { %572 = vsyncpa [#allocation3], 1 }

</bundles_post_ra>
